<compile_context>
chip_gen: v6e
topology: v6e:2x2x1
jax: 0.10.0
libtpu: 0.0.40
codegen_flags: <defaults>
</compile_context>

<pallas_src>
import jax
import jax.numpy as jnp
from jax.experimental import pallas as pl
from jax.experimental.pallas import tpu as pltpu

# Logical sizes (match nn.Linear(784,128) -> (128,64) -> (64,10))
IN_FEATURES = 28 * 28   # 784
H1 = 128
H2 = 64
OUT = 10

TILE_B_MAX = 2048       # per-step x tile: 6.3 MiB f32 / 3.1 MiB bf16 (x2 buffers)


def _round_up(x, m):
    return ((x + m - 1) // m) * m


def mlp_kernel(x_ref, w1_ref, b1_ref, w2_ref, b2_ref, w3_ref, b3_ref, o_ref):
    # x tile arrives in f32 or bf16; matmuls run bf16 on the MXU, f32 accumulate.
    x = x_ref[...].astype(jnp.bfloat16)

    # fc1 + ReLU   (tile_b, 784) @ (784, 128)
    h1 = jnp.dot(x, w1_ref[...], preferred_element_type=jnp.float32)
    h1 = jnp.maximum(h1 + b1_ref[...], 0.0)

    # fc2 + ReLU   (tile_b, 128) @ (128, 64)
    h2 = jnp.dot(h1.astype(jnp.bfloat16), w2_ref[...],
                 preferred_element_type=jnp.float32)
    h2 = jnp.maximum(h2 + b2_ref[...], 0.0)

    # fc3          (tile_b, 64) @ (64, 10)
    o = jnp.dot(h2.astype(jnp.bfloat16), w3_ref[...],
                preferred_element_type=jnp.float32)
    o_ref[...] = (o + b3_ref[...]).astype(o_ref.dtype)


def prepare_params(params):
    """Weights ((in, out) layout) cast to bf16 for the MXU; biases stay f32 (1, N).
    No padding anywhere -- block shapes equal the full weight/bias dims."""
    w1, b1, w2, b2, w3, b3 = params
    bf = jnp.bfloat16
    return (w1.astype(bf), b1, w2.astype(bf), b2, w3.astype(bf), b3)


def _pick_tile_b(B):
    # Tiny batches: a single (possibly partial) block, rounded to 16 rows so the
    # block second-minor dim is legal for both f32 (8) and bf16 (16) inputs.
    if B <= 1024:
        return max(16, _round_up(B, 16))
    # Large batches: big tiles amortize per-step pipeline overhead, but keep at
    # least 2 grid steps so both v7x TensorCores get work via "parallel".
    return min(TILE_B_MAX, _round_up((B + 1) // 2, 16))


def mlp_forward(x, kernel_params):
    """x: any shape flattening to (B, 784), f32 or bf16 (bf16 halves the dominant
    HBM stream).  kernel_params from prepare_params().  Returns (B, 10) f32."""
    w1, b1, w2, b2, w3, b3 = kernel_params
    x2d = x.reshape(-1, IN_FEATURES)          # == torch x.view(-1, 784)
    B = x2d.shape[0]

    tile_b = _pick_tile_b(B)
    grid = (pl.cdiv(B, tile_b),)

    flops = 2 * B * (IN_FEATURES * H1 + H1 * H2 + H2 * OUT)
    bytes_accessed = (int(x2d.size) * x2d.dtype.itemsize
                      + sum(int(a.size) * a.dtype.itemsize for a in kernel_params)
                      + B * OUT * 4)

    out = pl.pallas_call(
        mlp_kernel,
        out_shape=jax.ShapeDtypeStruct((B, OUT), jnp.float32),
        grid_spec=pltpu.PrefetchScalarGridSpec(
            num_scalar_prefetch=0,
            grid=grid,
            in_specs=[
                pl.BlockSpec((tile_b, IN_FEATURES), lambda i: (i, 0)),  # x: streamed
                pl.BlockSpec((IN_FEATURES, H1), lambda i: (0, 0)),      # weights: resident
                pl.BlockSpec((1, H1), lambda i: (0, 0)),
                pl.BlockSpec((H1, H2), lambda i: (0, 0)),
                pl.BlockSpec((1, H2), lambda i: (0, 0)),
                pl.BlockSpec((H2, OUT), lambda i: (0, 0)),
                pl.BlockSpec((1, OUT), lambda i: (0, 0)),
            ],
            out_specs=pl.BlockSpec((tile_b, OUT), lambda i: (i, 0)),
        ),
        compiler_params=pltpu.CompilerParams(
            dimension_semantics=("parallel",),    # batch tiles independent (megacore)
            vmem_limit_bytes=32 * 1024 * 1024,    # safe on v5e/v6e/v7x for tile_b<=2048
        ),
        cost_estimate=pl.CostEstimate(
            flops=flops, transcendentals=0, bytes_accessed=bytes_accessed),
    )(x2d, w1, b1, w2, b2, w3, b3)

    return out


def init_params(key):
    """nn.Linear-style U(-1/sqrt(fan_in), 1/sqrt(fan_in)) init.
    Weights stored as (in_features, out_features), f32 (reference form)."""
    sizes = [(IN_FEATURES, H1), (H1, H2), (H2, OUT)]
    params = []
    for fan_in, fan_out in sizes:
        key, kw, kb = jax.random.split(key, 3)
        bound = 1.0 / jnp.sqrt(jnp.float32(fan_in))
        w = jax.random.uniform(kw, (fan_in, fan_out), jnp.float32, -bound, bound)
        b = jax.random.uniform(kb, (1, fan_out), jnp.float32, -bound, bound)
        params.extend([w, b])
    return tuple(params)


def mlp_reference_f32(x, params):
    w1, b1, w2, b2, w3, b3 = params
    x2d = x.reshape(-1, IN_FEATURES).astype(jnp.float32)
    h1 = jnp.maximum(x2d @ w1 + b1, 0.0)
    h2 = jnp.maximum(h1 @ w2 + b2, 0.0)
    return h2 @ w3 + b3


def mlp_reference_bf16(x, params):
    """Reference with the same bf16-matmul / f32-accumulate recipe as the kernel."""
    w1, b1, w2, b2, w3, b3 = params
    bf = jnp.bfloat16
    x2d = x.reshape(-1, IN_FEATURES)
    h1 = jnp.dot(x2d.astype(bf), w1.astype(bf), preferred_element_type=jnp.float32) + b1
    h1 = jnp.maximum(h1, 0.0)
    h2 = jnp.dot(h1.astype(bf), w2.astype(bf), preferred_element_type=jnp.float32) + b2
    h2 = jnp.maximum(h2, 0.0)
    return jnp.dot(h2.astype(bf), w3.astype(bf), preferred_element_type=jnp.float32) + b3


if __name__ == "__main__":
    key = jax.random.PRNGKey(0)
    key, kx = jax.random.split(key)
    params = init_params(key)
    kernel_params = prepare_params(params)

    # Small MNIST-like NCHW batch.
    x = jax.random.normal(kx, (2, 1, 28, 28), jnp.float32)

    out = jax.block_until_ready(mlp_forward(x, kernel_params))
    assert out.shape == (2, OUT), out.shape

    # Tight check vs. a reference using the same bf16-matmul recipe.
    ref_bf16 = mlp_reference_bf16(x, params)
    assert jnp.allclose(out, ref_bf16, atol=1e-3, rtol=1e-3), "mismatch vs bf16 reference"

    # Loose sanity check vs. the pure f32 reference (bf16 matmul error budget).
    ref_f32 = mlp_reference_f32(x, params)
    assert jnp.allclose(out, ref_f32, atol=3e-2, rtol=3e-2), "mismatch vs f32 reference"

    # bf16-input fast path (halves the dominant HBM stream on real batches).
    out_bf = jax.block_until_ready(mlp_forward(x.astype(jnp.bfloat16), kernel_params))
    assert out_bf.shape == (2, OUT), out_bf.shape
    assert jnp.allclose(out_bf, ref_bf16, atol=1e-3, rtol=1e-3), "mismatch (bf16 input)"

    print("KERNEL_OK")
</pallas_src>

<mosaic_0001>
module attributes {stable_mosaic.version = 11 : i64} {
  func.func @mlp_kernel(%arg0: i32, %arg1: memref<16x784xf32, #tpu.memory_space<vmem>>, %arg2: memref<784x128xbf16, #tpu.memory_space<vmem>>, %arg3: memref<1x128xf32, #tpu.memory_space<vmem>>, %arg4: memref<128x64xbf16, #tpu.memory_space<vmem>>, %arg5: memref<1x64xf32, #tpu.memory_space<vmem>>, %arg6: memref<64x10xbf16, #tpu.memory_space<vmem>>, %arg7: memref<1x10xf32, #tpu.memory_space<vmem>>, %arg8: memref<16x10xf32, #tpu.memory_space<vmem>>) attributes {dimension_semantics = [#tpu.dimension_semantics<parallel>], iteration_bounds = array<i64: 1>, scalar_prefetch = 0 : i64, scratch_operands = 0 : i64, tpu.core_type = #tpu.core_type<tc>, window_params = [{transform_indices = @transform_0, window_bounds = array<i64: 16, 784>}, {pipeline_mode = #tpu.pipeline_mode<synchronous>, transform_indices = @transform_1, window_bounds = array<i64: 784, 128>}, {pipeline_mode = #tpu.pipeline_mode<synchronous>, transform_indices = @transform_2, window_bounds = array<i64: 1, 128>}, {pipeline_mode = #tpu.pipeline_mode<synchronous>, transform_indices = @transform_3, window_bounds = array<i64: 128, 64>}, {pipeline_mode = #tpu.pipeline_mode<synchronous>, transform_indices = @transform_4, window_bounds = array<i64: 1, 64>}, {pipeline_mode = #tpu.pipeline_mode<synchronous>, transform_indices = @transform_5, window_bounds = array<i64: 64, 10>}, {pipeline_mode = #tpu.pipeline_mode<synchronous>, transform_indices = @transform_6, window_bounds = array<i64: 1, 10>}, {transform_indices = @transform_7, window_bounds = array<i64: 16, 10>}]} {
    %c0 = arith.constant 0 : index
    %c0_0 = arith.constant 0 : index
    %0 = vector.load %arg1[%c0, %c0_0] : memref<16x784xf32, #tpu.memory_space<vmem>>, vector<16x784xf32>
    %1 = arith.truncf %0 : vector<16x784xf32> to vector<16x784xbf16>
    %c0_1 = arith.constant 0 : index
    %c0_2 = arith.constant 0 : index
    %2 = vector.load %arg2[%c0_1, %c0_2] : memref<784x128xbf16, #tpu.memory_space<vmem>>, vector<784x128xbf16>
    %cst = arith.constant dense<0.000000e+00> : vector<16x128xf32>
    %3 = tpu.matmul %1, %2, %cst {dimension_numbers = #tpu.dot_dimension_numbers<[1], [0], [0], [1], [0, 0, 1, 1], [], []>} : vector<16x784xbf16>, vector<784x128xbf16>, vector<16x128xf32> -> vector<16x128xf32>
    %c0_3 = arith.constant 0 : index
    %c0_4 = arith.constant 0 : index
    %4 = vector.load %arg3[%c0_3, %c0_4] : memref<1x128xf32, #tpu.memory_space<vmem>>, vector<1x128xf32>
    %5 = vector.broadcast %4 : vector<1x128xf32> to vector<16x128xf32>
    %6 = arith.addf %3, %5 : vector<16x128xf32>
    %cst_5 = arith.constant 0.000000e+00 : f32
    %7 = vector.broadcast %cst_5 : f32 to vector<16x128xf32>
    %8 = arith.maximumf %6, %7 : vector<16x128xf32>
    %9 = arith.truncf %8 : vector<16x128xf32> to vector<16x128xbf16>
    %c0_6 = arith.constant 0 : index
    %c0_7 = arith.constant 0 : index
    %10 = vector.load %arg4[%c0_6, %c0_7] : memref<128x64xbf16, #tpu.memory_space<vmem>>, vector<128x64xbf16>
    %cst_8 = arith.constant dense<0.000000e+00> : vector<16x64xf32>
    %11 = tpu.matmul %9, %10, %cst_8 {dimension_numbers = #tpu.dot_dimension_numbers<[1], [0], [0], [1], [0, 0, 1, 1], [], []>} : vector<16x128xbf16>, vector<128x64xbf16>, vector<16x64xf32> -> vector<16x64xf32>
    %c0_9 = arith.constant 0 : index
    %c0_10 = arith.constant 0 : index
    %12 = vector.load %arg5[%c0_9, %c0_10] : memref<1x64xf32, #tpu.memory_space<vmem>>, vector<1x64xf32>
    %13 = vector.broadcast %12 : vector<1x64xf32> to vector<16x64xf32>
    %14 = arith.addf %11, %13 : vector<16x64xf32>
    %cst_11 = arith.constant 0.000000e+00 : f32
    %15 = vector.broadcast %cst_11 : f32 to vector<16x64xf32>
    %16 = arith.maximumf %14, %15 : vector<16x64xf32>
    %17 = arith.truncf %16 : vector<16x64xf32> to vector<16x64xbf16>
    %c0_12 = arith.constant 0 : index
    %c0_13 = arith.constant 0 : index
    %18 = vector.load %arg6[%c0_12, %c0_13] : memref<64x10xbf16, #tpu.memory_space<vmem>>, vector<64x10xbf16>
    %cst_14 = arith.constant dense<0.000000e+00> : vector<16x10xf32>
    %19 = tpu.matmul %17, %18, %cst_14 {dimension_numbers = #tpu.dot_dimension_numbers<[1], [0], [0], [1], [0, 0, 1, 1], [], []>} : vector<16x64xbf16>, vector<64x10xbf16>, vector<16x10xf32> -> vector<16x10xf32>
    %c0_15 = arith.constant 0 : index
    %c0_16 = arith.constant 0 : index
    %20 = vector.load %arg7[%c0_15, %c0_16] : memref<1x10xf32, #tpu.memory_space<vmem>>, vector<1x10xf32>
    %21 = vector.broadcast %20 : vector<1x10xf32> to vector<16x10xf32>
    %22 = arith.addf %19, %21 : vector<16x10xf32>
    %c0_17 = arith.constant 0 : index
    %c0_18 = arith.constant 0 : index
    %23 = vector.load %arg8[%c0_17, %c0_18] : memref<16x10xf32, #tpu.memory_space<vmem>>, vector<16x10xf32>
    tpu.vector_store %arg8[%c0_17, %c0_18], %22 {strides = array<i32>} : memref<16x10xf32, #tpu.memory_space<vmem>>, vector<16x10xf32>,
    return
  }
  func.func @transform_0(%arg0: i32) -> (i32, i32) {
    %c0_i32 = arith.constant 0 : i32
    %c0_i32_0 = arith.constant 0 : i32
    return %arg0, %c0_i32 : i32, i32
  }
  func.func @transform_1(%arg0: i32) -> (i32, i32) {
    %c0_i32 = arith.constant 0 : i32
    %c0_i32_0 = arith.constant 0 : i32
    %c0_i32_1 = arith.constant 0 : i32
    return %c0_i32, %c0_i32_0 : i32, i32
  }
  func.func @transform_2(%arg0: i32) -> (i32, i32) {
    %c0_i32 = arith.constant 0 : i32
    %c0_i32_0 = arith.constant 0 : i32
    %c0_i32_1 = arith.constant 0 : i32
    return %c0_i32, %c0_i32_0 : i32, i32
  }
  func.func @transform_3(%arg0: i32) -> (i32, i32) {
    %c0_i32 = arith.constant 0 : i32
    %c0_i32_0 = arith.constant 0 : i32
    %c0_i32_1 = arith.constant 0 : i32
    return %c0_i32, %c0_i32_0 : i32, i32
  }
  func.func @transform_4(%arg0: i32) -> (i32, i32) {
    %c0_i32 = arith.constant 0 : i32
    %c0_i32_0 = arith.constant 0 : i32
    %c0_i32_1 = arith.constant 0 : i32
    return %c0_i32, %c0_i32_0 : i32, i32
  }
  func.func @transform_5(%arg0: i32) -> (i32, i32) {
    %c0_i32 = arith.constant 0 : i32
    %c0_i32_0 = arith.constant 0 : i32
    %c0_i32_1 = arith.constant 0 : i32
    return %c0_i32, %c0_i32_0 : i32, i32
  }
  func.func @transform_6(%arg0: i32) -> (i32, i32) {
    %c0_i32 = arith.constant 0 : i32
    %c0_i32_0 = arith.constant 0 : i32
    %c0_i32_1 = arith.constant 0 : i32
    return %c0_i32, %c0_i32_0 : i32, i32
  }
  func.func @transform_7(%arg0: i32) -> (i32, i32) {
    %c0_i32 = arith.constant 0 : i32
    %c0_i32_0 = arith.constant 0 : i32
    return %arg0, %c0_i32 : i32, i32
  }
}

</mosaic_0001>

<bundles_post_ra>
// kernel: tpu_custom_call.1
= control target key start
LH: loop header
LB: loop body
LE: loop exit
PB: predicated region body
PF: predicated region fallthrough
CT: control target
= control target key end

     0   :  { %12 = vsyncpa [#allocation3], 0  ;;  %s1536_s0 = inlined_call_operand.vmem [shape: f32[2,784], index: 0, kind: input, shape index: {}]   ;;  %s1537_s1 = inlined_call_operand.hbm [shape: bf16[784,128], index: 1, kind: input, shape index: {}]   ;;  %s1538_s2 = inlined_call_operand.vmem [shape: f32[1,128], index: 2, kind: input, shape index: {}]   ;;  %s1539_s3 = inlined_call_operand.vmem [shape: bf16[128,64], index: 3, kind: input, shape index: {}]   ;;  %s1540_s4 = inlined_call_operand.vmem [shape: f32[1,64], index: 4, kind: input, shape index: {}]   ;;  %s1541_s5 = inlined_call_operand.vmem [shape: bf16[64,10], index: 5, kind: input, shape index: {}]   ;;  %s1542_s6 = inlined_call_operand.vmem [shape: f32[1,10], index: 6, kind: input, shape index: {}]   ;;  %s1543_s7 = inlined_call_operand.hbm [shape: f32[2,10], index: 7, kind: output, shape index: {}]  }
   0x1   :  { %13 = vsyncpa [#allocation4], 0  ;;  %s1350_s24 = smov [#allocation2]  }
   0x2   :  { %s21_s25 = sshll.u32 %s1350_s24, 4  ;;  %s22_s25 = int_to_ptr.vmem [resolvable:$true] %s21_s25 }
   0x3   :  { %s1314_s26 = scalar_lea.vmem %s22_s25, 6272  ;;  %p1319_p1 = scmp.lt.s32.totalorder %s22_s25, %s22_s25 }
   0x4   :  { %p1315_p0 = scmp.ne.s32.totalorder %s22_s25, %s1314_s26  ;;  %p1320_p2 = scmp.lt.s32.totalorder %s1314_s26, %s1314_s26 }
   0x6   :  { %p1321_p3 = por %p1320_p2, %p1319_p1 }
   0x8   :  { %p1322_p4 = pnand %p1321_p3, %p1315_p0 }
   0xa   :  { %1325 = shalt.err (!%p1322_p4)
}
   0xb   :  { %s1351_s27 = smov 64   ;;  %s1352_s28 = smov 4  }
   0xc   :  { %27 = dma.hbm_to_vmem [thread:$0]  %s1537_s1, 6272, %s22_s25, [#allocation3], %s1351_s27, %s1351_s27, %s1352_s28  }
   0xd   :  { %1346 = dma.done.wait [#allocation3], 6272  }
   0xe   :  { %1347 = vsyncadd [#allocation3], 4294961024  ;;  %v1221_v0 = vld [vmem:[#allocation2 + $0x78] sm:$0xff]   ;;  %v1225_v4 = vld [vmem:[#allocation2 + $0x70] sm:$0xff]   ;;  %v1353_v24 = vmov 1983009808   ;;  %v81_v26 = vlaneseq }
   0xf   :  { %v1222_v1 = vld [vmem:[#allocation2 + $0x38] sm:$0xff]   ;;  %1092 = vmatprep.subr.bf16.mxu0 %v1221_v0  ;;  %v1226_v5 = vld [vmem:[#allocation2 + $0x30] sm:$0xff]   ;;  %v1229_v8 = vld [vmem:[#allocation2 + $0x68] sm:$0xff]   ;;  %v79_v25 = vunpack.c.l.s4 %v1353_v24  ;;  %v1354_v58 = vmov 0.0   ;;  %vm1355_vm0 = vmmov 0   ;;  %vm636_vm1 = vcmask 130048  }
  0x10   :  { %v1223_v2 = vld [vmem:[#allocation2 + $0xf8] sm:$0xff]   ;;  %1093 = vmatpush3.bf16.msra.mxu0 %v1222_v1  ;;  %v1227_v6 = vld [vmem:[#allocation2 + $0xf0] sm:$0xff]   ;;  %v1230_v9 = vld [vmem:[#allocation2 + $0x28] sm:$0xff]   ;;  %v82_v32 = vshrl.u32 %v81_v26, 7  ;;  %vm961_vm2 = vcmask 523264   ;;  %vm1006_vm3 = vcmask 80896  }
  0x11   :  { %v1224_v3 = vld [vmem:[#allocation2 + $0xb8] sm:$0xff]   ;;  %1114 = vmatprep.subr.bf16.mxu1 %v1223_v2  ;;  %1094 = vmatprep.subr.bf16.mxu0 %v1225_v4  ;;  %v1228_v7 = vld [vmem:[#allocation2 + $0xb0] sm:$0xff]   ;;  %v1231_v10 = vld [vmem:[#allocation2 + $0xe8] sm:$0xff]   ;;  %v80_v31 = vunpack.c.0.s8 %v79_v25 }
  0x12   :  { %1115 = vmatpush3.bf16.msra.mxu1 %v1224_v3  ;;  %v1232_v11 = vld [vmem:[#allocation2 + $0xa8] sm:$0xff]   ;;  %v1233_v12 = vld [vmem:[#allocation2 + $0x60] sm:$0xff]   ;;  %v1237_v16 = vld [vmem:[#allocation2 + $0x58] sm:$0xff]  }
  0x13   :  { %1116 = vmatprep.subr.bf16.mxu1 %v1227_v6  ;;  %v1234_v13 = vld [vmem:[#allocation2 + $0x20] sm:$0xff]   ;;  %v1238_v17 = vld [vmem:[#allocation2 + $0x18] sm:$0xff]   ;;  %v1241_v20 = vld [vmem:[#allocation2 + $0x50] sm:$0xff]   ;;  %v1402_v36 = vsub.s32 %v80_v31, %v82_v32 }
  0x14   :  { %1095 = vmatpush3.bf16.msra.mxu0 %v1226_v5  ;;  %v1235_v14 = vld [vmem:[#allocation2 + $0xe0] sm:$0xff]   ;;  %v1239_v18 = vld [vmem:[#allocation2 + $0xd8] sm:$0xff]   ;;  %v1242_v21 = vld [vmem:[#allocation2 + $0x10] sm:$0xff]  }
  0x15   :  { %1096 = vmatprep.subr.bf16.mxu0 %v1229_v8  ;;  %v1236_v15 = vld [vmem:[#allocation2 + $0xa0] sm:$0xff]   ;;  %v1240_v19 = vld [vmem:[#allocation2 + $0x98] sm:$0xff]   ;;  %v1243_v22 = vld [vmem:[#allocation2 + $0xd0] sm:$0xff]  }
  0x16   :  { %1117 = vmatpush3.bf16.msra.mxu1 %v1228_v7  ;;  %v1244_v23 = vld [vmem:[#allocation2 + $0x90] sm:$0xff]   ;;  %v1245_v27 = vld [vmem:[#allocation2 + $0x48] sm:$0xff]   ;;  %v1249_v33 = vld [vmem:[#allocation2 + $0x40] sm:$0xff]  }
  0x17   :  { %1118 = vmatprep.subr.bf16.mxu1 %v1231_v10  ;;  %v1246_v28 = vld [vmem:[#allocation2 + $0x8] sm:$0xff]   ;;  %v1250_v34 = vld [vmem:[#allocation2] sm:$0xff]   ;;  %v1261_v46 = vld [vmem:[#allocation2 + $0x178] sm:$0xff]  }
  0x18   :  { %1097 = vmatpush3.bf16.msra.mxu0 %v1230_v9  ;;  %v1247_v29 = vld [vmem:[#allocation2 + $0xc8] sm:$0xff]   ;;  %v1251_v35 = vld [vmem:[#allocation2 + $0xc0] sm:$0xff]   ;;  %v1266_v62 = vld [vmem:[#allocation2 + $0x138] sm:$0xff]  }
  0x19   :  { %1098 = vmatprep.subr.bf16.mxu0 %v1233_v12  ;;  %v1248_v30 = vld [vmem:[#allocation2 + $0x88] sm:$0xff]   ;;  %v1258_v40 = vld [vmem:[%s1536_s0 + $0x54] ss:$14 sps:$4 sm:$0xff]   ;;  %v1274_v12 = vld [vmem:[#allocation2 + $0x118] sm:$0xff]  }
  0x1a   :  { %1119 = vmatpush3.bf16.msra.mxu1 %v1232_v11  ;;  %v1252_v37 = vld [vmem:[%s1536_s0] ss:$14 sps:$4 sm:$0xff]   ;;  %v1254_v38 = vld [vmem:[%s1536_s0 + $0x1c] ss:$14 sps:$4 sm:$0xff]   ;;  %v1256_v39 = vld [vmem:[%s1536_s0 + $0x38] ss:$14 sps:$4 sm:$0xff]   ;;  %v169_v45 = vrot.slane %v1258_v40, %v1402_v36 }
  0x1b   :  { %1120 = vmatprep.subr.bf16.mxu1 %v1235_v14  ;;  %v84_v41 = vrot.slane %v1252_v37, %v1402_v36  ;;  %v1260_v42 = vld [vmem:[#allocation2 + $0x80] sm:$0xff]   ;;  %v98_v43 = vrot.slane %v1254_v38, %v1402_v36  ;;  %v155_v44 = vrot.slane %v1256_v39, %v1402_v36  ;;  %v1264_v49 = vld [vmem:[%s1536_s0 + $0x3c] ss:$14 sps:$4 sm:$0xff]   ;;  %v1267_v1 = vld [vmem:[#allocation2 + $0x170] sm:$0xff]  }
  0x1c   :  { %1099 = vmatpush3.bf16.msra.mxu0 %v1234_v13  ;;  %v1262_v47 = vld [vmem:[%s1536_s0 + $0x4] ss:$14 sps:$4 sm:$0xff]   ;;  %v1263_v48 = vld [vmem:[%s1536_s0 + $0x20] ss:$14 sps:$4 sm:$0xff]   ;;  %v162_v57 = vrot.slane %v1264_v49, %v1402_v36  ;;  %v1273_v11 = vld [vmem:[#allocation2 + $0x158] sm:$0xff]  }
  0x1d   :  { %1100 = vmatprep.subr.bf16.mxu0 %v1237_v16  ;;  %v107_v50 = vcombine.high %v84_v41, %v98_v43  ;;  %v178_v51 = vcombine.high %v155_v44, %v169_v45  ;;  %v106_v52 = vcombine.low %v84_v41, %v98_v43  ;;  %v177_v53 = vcombine.low %v155_v44, %v169_v45  ;;  %v1265_v54 = vld [vmem:[%s1536_s0 + $0x58] ss:$14 sps:$4 sm:$0xff]   ;;  %v1268_v6 = vld [vmem:[#allocation2 + $0x130] sm:$0xff]  }
  0x1e   :  { %1121 = vmatpush3.bf16.msra.mxu1 %v1236_v15  ;;  %v91_v55 = vrot.slane %v1262_v47, %v1402_v36  ;;  %v105_v56 = vrot.slane %v1263_v48, %v1402_v36  ;;  %v176_v61 = vrot.slane %v1265_v54, %v1402_v36  ;;  %v1269_v7 = vld [vmem:[#allocation2 + $0x168] sm:$0xff]   ;;  %v1271_v9 = vld [vmem:[#allocation2 + $0x160] sm:$0xff]   ;;  %v1275_v14 = vld [vmem:[#allocation2 + $0x150] sm:$0xff]  }
  0x1f   :  { %1122 = vmatprep.subr.bf16.mxu1 %v1239_v18  ;;  %v231_v59 = vpack.c.bf16 %v178_v51, %v107_v50  ;;  %v230_v60 = vpack.c.bf16 %v177_v53, %v106_v52  ;;  %v1270_v8 = vld [vmem:[#allocation2 + $0x128] sm:$0xff]   ;;  %v1272_v10 = vld [vmem:[#allocation2 + $0x120] sm:$0xff]   ;;  %v1294_v45 = vld [vmem:[%s1539_s3 + $0x38] sm:$0xff]  }
  0x20   :  { %1101 = vmatpush3.bf16.msra.mxu0 %v1238_v17  ;;  %v109_v63 = vcombine.high %v91_v55, %v105_v56  ;;  %v108_v0 = vcombine.low %v91_v55, %v105_v56  ;;  %v180_v2 = vcombine.high %v162_v57, %v176_v61  ;;  %v179_v3 = vcombine.low %v162_v57, %v176_v61  ;;  %v1281_v13 = vld [vmem:[#allocation2 + $0x180] sm:$0xff]   ;;  %v1282_v15 = vld [vmem:[%s1536_s0 + $0x8] ss:$14 sps:$4 sm:$0xff]   ;;  %v1284_v16 = vld [vmem:[%s1536_s0 + $0xc] ss:$14 sps:$4 sm:$0x33]  }
  0x21   :  { %1102 = vmatprep.subr.bf16.mxu0 %v1241_v20  ;;  %672 = vmatprep.mubr.bf16.mxu0 %v231_v59  ;;  %v1285_v17 = vld [vmem:[%s1536_s0 + $0x24] ss:$14 sps:$4 sm:$0xff]   ;;  %v1287_v18 = vld [vmem:[%s1536_s0 + $0x28] ss:$14 sps:$4 sm:$0x33]   ;;  %v120_v20 = vrot.slane %v1282_v15, %v1402_v36  ;;  %v1298_v49 = vld [vmem:[%s1539_s3 + $0x18] sm:$0xff]  }
  0x22   :  { %1123 = vmatpush3.bf16.msra.mxu1 %v1240_v19  ;;  %v233_v4 = vpack.c.bf16 %v180_v2, %v109_v63  ;;  %v232_v5 = vpack.c.bf16 %v179_v3, %v108_v0  ;;  %v1276_v19 = vld [vmem:[#allocation2 + $0x110] sm:$0xff]   ;;  %v1277_v24 = vld [vmem:[#allocation2 + $0x148] sm:$0xff]   ;;  %v134_v25 = vrot.slane %v1285_v17, %v1402_v36  ;;  %v141_v26 = vrot.slane %v1287_v18, %v1402_v36  ;;  %v1280_v40 = vld [vmem:[#allocation2 + $0x100] sm:$0xff]  }
  0x23   :  { %1124 = vmatprep.subr.bf16.mxu1 %v1243_v22  ;;  %v1288_v22 = vld [vmem:[%s1536_s0 + $0x40] ss:$14 sps:$4 sm:$0xff]   ;;  %v1302_v53 = vld [vmem:[%s1541_s5 + $0x18] sm:$0xff]  }
  0x24   :  { %1103 = vmatpush3.bf16.msra.mxu0 %v1242_v21  ;;  %713 = vmatprep.mubr.bf16.mxu1 %v233_v4  ;;  %v127_v21 = vrot.slane %v1284_v16, %v1402_v36  ;;  %v1278_v31 = vld [vmem:[#allocation2 + $0x108] sm:$0xff]   ;;  %v143_v32 = vcombine.high %v120_v20, %v134_v25  ;;  %v142_v43 = vcombine.low %v120_v20, %v134_v25  ;;  %v1297_v48 = vld [vmem:[%s1539_s3 + $0x20] sm:$0xff]   ;;  %v1299_v50 = vld [vmem:[%s1539_s3 + $0x10] sm:$0xff]  }
  0x25   :  { %1104 = vmatprep.subr.bf16.mxu0 %v1245_v27  ;;  %v1291_v27 = vld [vmem:[%s1536_s0 + $0x5c] ss:$14 sps:$4 sm:$0xff]   ;;  %v1301_v52 = vld [vmem:[%s1539_s3] sm:$0xff]   ;;  %v1303_v25 = vld [vmem:[%s1541_s5 + $0x10] sm:$0xff]  }
  0x26   :  { %1125 = vmatpush3.bf16.msra.mxu1 %v1244_v23  ;;  %v1290_v23 = vld [vmem:[%s1536_s0 + $0x44] ss:$14 sps:$4 sm:$0x33]   ;;  %v144_v37 = vcombine.low %v127_v21, %v141_v26  ;;  %v1296_v47 = vld [vmem:[%s1539_s3 + $0x28] sm:$0xff]   ;;  %v1026_v0 = vld [vmem:[%s1538_s2] ss:$0 sm:$0xff] }
  0x27   :  { %1126 = vmatprep.subr.bf16.mxu1 %v1247_v29  ;;  %v191_v29 = vrot.slane %v1288_v22, %v1402_v36  ;;  %v1300_v51 = vld [vmem:[%s1539_s3 + $0x8] sm:$0xff]  }
  0x28   :  { %1105 = vmatpush3.bf16.msra.mxu0 %v1246_v28  ;;  %v1293_v28 = vld [vmem:[%s1536_s0 + $0x60] ss:$14 sps:$4 sm:$0x33]  }
  0x29   :  { %1106 = vmatprep.subr.bf16.mxu0 %v1249_v33  ;;  %v205_v33 = vrot.slane %v1291_v27, %v1402_v36  ;;  %v1304_v26 = vld [vmem:[%s1541_s5 + $0x8] sm:$0xff]   ;;  %v1305_v27 = vld [vmem:[%s1541_s5] sm:$0xff]  }
  0x2a   :  { %1127 = vmatpush3.bf16.msra.mxu1 %v1248_v30  ;;  %v198_v30 = vrot.slane %v1290_v23, %v1402_v36 }
  0x2b   :  { %1128 = vmatprep.subr.bf16.mxu1 %v1251_v35  ;;  %v1279_v35 = vld [vmem:[#allocation2 + $0x140] sm:$0xff]   ;;  %v214_v38 = vcombine.high %v191_v29, %v205_v33  ;;  %v213_v44 = vcombine.low %v191_v29, %v205_v33 }
  0x2c   :  { %1107 = vmatpush3.bf16.msra.mxu0 %v1250_v34  ;;  %v212_v34 = vrot.slane %v1293_v28, %v1402_v36  ;;  %v1077_v28 = vld [vmem:[%s1540_s4] ss:$0 sm:$0xff] }
  0x2d   :  { %1136 = vmatprep.subr.bf16.mxu0 %v1261_v46  ;;  %v235_v41 = vpack.c.bf16 %v214_v38, %v143_v32  ;;  %v234_v36 = vpack.c.bf16 %v213_v44, %v142_v43  ;;  %v1295_v46 = vld [vmem:[%s1539_s3 + $0x30] sm:$0xff]  }
  0x2e   :  { %1129 = vmatpush3.bf16.msra.mxu1 %v1260_v42  ;;  %v215_v39 = vcombine.low %v198_v30, %v212_v34 }
  0x2f   :  { %1174 = vmatprep.subr.bf16.mxu1 %v1354_v58  ;;  %673 = vmatmul.mubr.bf16.vlgmr.msra.gmra.mxu0 %v230_v60 }
  0x30   :  { %1137 = vmatpush3.bf16.msra.mxu0 %v1266_v62  ;;  %v236_v42 = vpack.c.bf16 %v215_v39, %v144_v37  ;;  %754 = vmatprep.mubr.bf16.mxu0 %v235_v41 }
  0x31   :  { %1138 = vmatprep.subr.bf16.mxu0 %v1267_v1  ;;  %714 = vmatmul.mubr.bf16.vlgmr.msra.gmra.mxu1 %v232_v5 }
  0x32   :  { %1176 = vmatprep.mubr.msk.bf16.mxu1 %vm1355_vm0, %v1354_v58  ;;  %1175 = vmatpush3.bf16.msra.mxu1 %v1281_v13 }
  0x33   :  { %1180 = vmatprep.subr.bf16.mxu1 %v1354_v58 }
  0x34   :  { %1139 = vmatpush3.bf16.msra.mxu0 %v1268_v6 }
  0x35   :  { %1140 = vmatprep.subr.bf16.mxu0 %v1269_v7 }
  0x38   :  { %1141 = vmatpush3.bf16.msra.mxu0 %v1270_v8 }
  0x39   :  { %1142 = vmatprep.subr.bf16.mxu0 %v1271_v9  ;;  %1177 = vmatmul.mubr.msk.bf16.vlgmr.msra.gmra.mxu1 %vm636_vm1, %v236_v42 }
  0x3a   :  { %1196 = vmatprep.mubr.msk.bf16.mxu1 %vm1355_vm0, %v1354_v58  ;;  %1181 = vmatpush3.bf16.msra.mxu1 %v1294_v45 }
  0x3b   :  { %1182 = vmatprep.subr.bf16.mxu1 %v1354_v58 }
  0x3c   :  { %1143 = vmatpush3.bf16.msra.mxu0 %v1272_v10 }
  0x3d   :  { %1144 = vmatprep.subr.bf16.mxu0 %v1273_v11 }
  0x3e   :  { %1183 = vmatpush3.bf16.msra.mxu1 %v1295_v46 }
  0x3f   :  { %1184 = vmatprep.subr.bf16.mxu1 %v1354_v58 }
  0x40   :  { %1145 = vmatpush3.bf16.msra.mxu0 %v1274_v12 }
  0x41   :  { %1146 = vmatprep.subr.bf16.mxu0 %v1275_v14 }
  0x42   :  { %1185 = vmatpush3.bf16.msra.mxu1 %v1296_v47 }
  0x43   :  { %1186 = vmatprep.subr.bf16.mxu1 %v1354_v58 }
  0x44   :  { %1147 = vmatpush3.bf16.msra.mxu0 %v1276_v19 }
  0x45   :  { %1148 = vmatprep.subr.bf16.mxu0 %v1277_v24 }
  0x46   :  { %1187 = vmatpush3.bf16.msra.mxu1 %v1297_v48 }
  0x47   :  { %1188 = vmatprep.subr.bf16.mxu1 %v1354_v58 }
  0x48   :  { %1149 = vmatpush3.bf16.msra.mxu0 %v1278_v31 }
  0x49   :  { %1150 = vmatprep.subr.bf16.mxu0 %v1279_v35 }
  0x4a   :  { %1189 = vmatpush3.bf16.msra.mxu1 %v1298_v49 }
  0x4b   :  { %1190 = vmatprep.subr.bf16.mxu1 %v1354_v58 }
  0x4c   :  { %1151 = vmatpush3.bf16.msra.mxu0 %v1280_v40 }
  0x4d   :  { %1200 = vmatprep.subr.bf16.mxu0 %v1354_v58 }
  0x4e   :  { %1191 = vmatpush3.bf16.msra.mxu1 %v1299_v50 }
  0x4f   :  { %755 = vmatmul.mubr.bf16.vlgmr.msra.gmra.mxu0 %v234_v36  ;;  %1192 = vmatprep.subr.bf16.mxu1 %v1354_v58 }
  0x50   :  { %1208 = vmatprep.mubr.msk.bf16.mxu0 %vm1355_vm0, %v1354_v58  ;;  %1201 = vmatpush3.bf16.msra.mxu0 %v1302_v53 }
  0x51   :  { %1202 = vmatprep.subr.bf16.mxu0 %v1354_v58 }
  0x52   :  { %1193 = vmatpush3.bf16.msra.mxu1 %v1300_v51 }
  0x53   :  { %1194 = vmatprep.subr.bf16.mxu1 %v1354_v58 }
  0x54   :  { %1203 = vmatpush3.bf16.msra.mxu0 %v1303_v25 }
  0x55   :  { %1204 = vmatprep.subr.bf16.mxu0 %v1354_v58 }
  0x56   :  { %1195 = vmatpush3.bf16.msra.mxu1 %v1301_v52 }
  0x58   :  { %1205 = vmatpush3.bf16.msra.mxu0 %v1304_v26 }
  0x59   :  { %1206 = vmatprep.subr.bf16.mxu0 %v1354_v58  ;;  %v1086_v58 = vld [vmem:[%s1542_s6] ss:$0 sm:$0xff] }
  0x5c   :  { %1207 = vmatpush3.bf16.msra.mxu0 %v1305_v27 }
  0xef   :  { %v1108_v55 = vpop.f32.mrf.mxu0 }
  0xf1   :  { %v1130_v54 = vpop.f32.mrf.mxu1  ;;  %v1109_v57 = vpop.f32.mrf.mxu0 }
  0xf2   :  { %v1110_v63 = vadd.f32 %v1109_v57, %v1108_v55 }
  0xf3   :  { %v1131_v56 = vpop.f32.mrf.mxu1  ;;  %v1111_v60 = vpop.f32.mrf.mxu0 }
  0xf4   :  { %v675_v4 = vadd.f32 %v1110_v63, %v1026_v0  ;;  %v1132_v5 = vadd.f32 %v1131_v56, %v1130_v54 }
  0xf5   :  { %v1133_v59 = vpop.f32.mrf.mxu1  ;;  %v1112_v1 = vpop.f32.mrf.mxu0 }
  0xf6   :  { %v1113_v6 = vadd.f32 %v1112_v1, %v1111_v60  ;;  %v716_v10 = vadd.f32 %v1132_v5, %v675_v4 }
  0xf7   :  { %v1134_v61 = vpop.f32.mrf.mxu1 }
  0xf8   :  { %v678_v11 = vadd.f32 %v1113_v6, %v1026_v0  ;;  %v1135_v12 = vadd.f32 %v1134_v61, %v1133_v59 }
  0xf9   :  { %v797_v62 = vpop.f32.mrf.mxu1 }
  0xfa   :  { %v719_v17 = vadd.f32 %v1135_v12, %v678_v11 }
  0xfb   :  { %v1178_v2 = vpop.f32.mrf.mxu1 }
  0xfd   :  { %v800_v3 = vpop.f32.mrf.mxu1 }
  0xff   :  { %v1179_v8 = vpop.f32.mrf.mxu1 }
 0x10f   :  { %v1152_v7 = vpop.f32.mrf.mxu0 }
 0x111   :  { %v1153_v9 = vpop.f32.mrf.mxu0 }
 0x112   :  { %v1154_v13 = vadd.f32 %v1153_v9, %v1152_v7 }
 0x113   :  { %v1155_v14 = vpop.f32.mrf.mxu0 }
 0x114   :  { %v757_v15 = vadd.f32 %v1154_v13, %v716_v10 }
 0x115   :  { %v1156_v16 = vpop.f32.mrf.mxu0 }
 0x116   :  { %v1157_v18 = vadd.f32 %v1156_v16, %v1155_v14  ;;  %v798_v19 = vadd.f32 %v797_v62, %v757_v15 }
 0x118   :  { %v760_v20 = vadd.f32 %v1157_v18, %v719_v17  ;;  %v804_v22 = vmax.f32 %v798_v19, 0.0 }
 0x11a   :  { %v801_v21 = vadd.f32 %v800_v3, %v760_v20 }
 0x11c   :  { %v805_v23 = vmax.f32 %v801_v21, 0.0 }
 0x11e   :  { %v806_v24 = vpack.c.bf16 %v805_v23, %v804_v22 }
 0x120   :  { %1197 = vmatmul.mubr.bf16.vlgmr.msra.gmra.mxu1 %v806_v24 }
 0x1e0   :  { %v912_v29 = vpop.f32.mrf.mxu1 }
 0x1e1   :  { %v913_v31 = vadd.f32 %v1077_v28, %v912_v29 }
 0x1e2   :  { %v1198_v30 = vpop.f32.mrf.mxu1 }
 0x1e3   :  { %v919_v35 = vmax.f32 %v913_v31, 0.0 }
 0x1e4   :  { %v915_v32 = vpop.f32.mrf.mxu1 }
 0x1e5   :  { %v916_v33 = vadd.f32 %v1077_v28, %v915_v32 }
 0x1e6   :  { %v1199_v34 = vpop.f32.mrf.mxu1 }
 0x1e7   :  { %v920_v37 = vmax.f32 %v916_v33, 0.0 }
 0x1e9   :  { %v921_v38 = vpack.c.bf16 %v920_v37, %v919_v35 }
 0x1eb   :  { %1209 = vmatmul.mubr.msk.bf16.vlgmr.msra.gmra.mxu0 %vm961_vm2, %v921_v38 }
 0x2ab   :  { %v999_v39 = vpop.f32.mrf.mxu0 }
 0x2ac   :  { %v1000_v40 = vadd.f32 %v1086_v58, %v999_v39 }
 0x2ad   :  { %v1210_v41 = vpop.f32.mrf.mxu0 }
 0x2ae   :  { %1007 = vst.msk [vmem:[#allocation5] sm:$0xff] %vm1006_vm3, %v1000_v40 }
 0x2af   :  { %v1002_v42 = vpop.f32.mrf.mxu0 }
 0x2b0   :  { %v1003_v43 = vadd.f32 %v1086_v58, %v1002_v42 }
 0x2b1   :  { %v1211_v44 = vpop.f32.mrf.mxu0 }
 0x2b2   :  { %1008 = vst.msk [vmem:[#allocation5 + $0x8] sm:$0xff] %vm1006_vm3, %v1003_v43 }
 0x2b3   :  { %1013 = vsyncadd [#allocation4], 224  ;;  %s1356_s4 = smov [#allocation5]  }
 0x2b4   :  { %s1014_s5 = sshll.u32 %s1356_s4, 4  ;;  %s1015_s5 = int_to_ptr.vmem [resolvable:$true] %s1014_s5 }
 0x2b5   :  { %s1326_s17 = scalar_lea.vmem %s1015_s5, 32  ;;  %s1330_s18 = scalar_lea.vmem %s1015_s5, 256 }
 0x2b6   :  { %p1327_p5 = scmp.ne.s32.totalorder %s1015_s5, %s1326_s17  ;;  %p1331_p6 = scmp.lt.s32.totalorder %s1015_s5, %s1015_s5 }
 0x2b7   :  { %p1332_p7 = scmp.lt.s32.totalorder %s1330_s18, %s1326_s17 }
 0x2b9   :  { %p1333_p8 = por %p1332_p7, %p1331_p6 }
 0x2bb   :  { %p1334_p9 = pnand %p1333_p8, %p1327_p5 }
 0x2bd   :  { %1337 = shalt.err (!%p1334_p9)
}
 0x2be   :  { %s1357_s6 = smov 32   ;;  %s1358_s19 = smov 2  }
 0x2bf   :  { %1020 = dma.vmem_to_hbm [thread:$0]  %s1015_s5, 32, %s1543_s7, [#allocation4], %s1357_s6, %s1357_s6, %s1358_s19  }
 0x2c0   :  { %1348 = dma.done.wait [#allocation4], 256  }
 0x2c1   :  { %1349 = vsyncadd [#allocation4], 4294967040 }
 0x2c2   :  { %1024 = vsyncpa [#allocation3], 1 }
 0x2c3   :  { %1025 = vsyncpa [#allocation4], 1 }

</bundles_post_ra>
